<compile_context>
chip_gen: v7x
topology: tpu7x:2x2x1
jax: 0.10.0
libtpu: 0.0.40
codegen_flags: <defaults>
</compile_context>

<pallas_src>
import jax
import jax.numpy as jnp
from jax.experimental import pallas as pl
from jax.experimental.pallas import tpu as pltpu

LANE = 128     # lane width (fast axis of a vreg)
SUBLANE = 8    # sublane width (slow axis of a vreg)


def _round_up(x, m):
    return ((x + m - 1) // m) * m


# ---------------------------------------------------------------------------
# Kernel: entire 3-layer MLP hot path (3 matmuls + biases + ReLUs) fused.
# ---------------------------------------------------------------------------
def mlp_actor_kernel(x_ref, w1_ref, b1_ref, w2_ref, b2_ref, w3_ref, b3_ref, o_ref):
    # bf16 only on the MXU path; elementwise (bias/ReLU) and accumulation stay f32.
    x = x_ref[...].astype(jnp.bfloat16)

    h1 = jnp.dot(x, w1_ref[...], preferred_element_type=jnp.float32) + b1_ref[...]
    h1 = jnp.maximum(h1, 0.0).astype(jnp.bfloat16)

    h2 = jnp.dot(h1, w2_ref[...], preferred_element_type=jnp.float32) + b2_ref[...]
    h2 = jnp.maximum(h2, 0.0).astype(jnp.bfloat16)

    logits = jnp.dot(h2, w3_ref[...], preferred_element_type=jnp.float32) + b3_ref[...]
    o_ref[...] = logits.astype(o_ref.dtype)


# ---------------------------------------------------------------------------
# Tiling / VMEM helpers.
# ---------------------------------------------------------------------------
def _pick_tile_b(batch, max_tile=1024):
    if batch <= SUBLANE:
        return batch  # single tile; block equals the full batch dim (allowed)
    # Big tiles amortize per-step overhead; keep >= 2 grid steps for v7x megacore.
    return min(max_tile, _round_up(pl.cdiv(batch, 2), SUBLANE))


def _vmem_limit_bytes(param_bytes, tile_b, in_p, hid_p, out_p):
    f32 = 4
    # Weights counted once (Buffered(1)); x/out tiles double-buffered; f32+bf16 temps.
    act_bytes = 2 * tile_b * in_p * f32 + 2 * tile_b * out_p * f32
    tmp_bytes = 2 * tile_b * hid_p * (f32 + 2)
    needed = param_bytes + act_bytes + tmp_bytes
    try:
        cap = int(pltpu.get_tpu_info().vmem_capacity_bytes * 0.8)  # headroom for scratch
    except Exception:
        cap = 48 * 1024 * 1024  # conservative: safe under v7x's 64 MiB/TC
    return int(min(cap, max(4 * 1024 * 1024, int(needed * 1.25) + (2 << 20))))


# ---------------------------------------------------------------------------
# Wrapper: batch-tiled grid, weight-resident single-buffered specs, lane-padded feats.
# ---------------------------------------------------------------------------
def mlp_actor_forward(x, padded_params, output_dim, *, tile_b=None):
    """x: [batch, input_dim] f32 -> logits: [batch, output_dim] f32."""
    w1, b1, w2, b2, w3, b3 = padded_params
    batch, input_dim = x.shape
    in_p, hid_p = w1.shape
    out_p = w3.shape[1]
    assert input_dim == in_p, "x feature dim must match w1 input dim"

    if tile_b is None:
        tile_b = _pick_tile_b(batch)
    elif batch <= SUBLANE:
        tile_b = batch
    else:
        tile_b = min(_round_up(tile_b, SUBLANE), _round_up(batch, SUBLANE))

    grid = (pl.cdiv(batch, tile_b),)

    param_bytes = sum(int(p.size) * p.dtype.itemsize for p in padded_params)
    act_bytes = batch * (in_p + out_p) * 4
    flops = 2 * batch * (in_p * hid_p + hid_p * hid_p + hid_p * out_p)
    cost = pl.CostEstimate(
        flops=flops, transcendentals=0, bytes_accessed=param_bytes + act_bytes
    )

    weight_mode = pl.Buffered(1)  # constant-index blocks: DMA'd once, single buffer

    out = pl.pallas_call(
        mlp_actor_kernel,
        out_shape=jax.ShapeDtypeStruct((batch, out_p), jnp.float32),
        grid=grid,
        in_specs=[
            pl.BlockSpec((tile_b, in_p), lambda i: (i, 0)),  # activations stream
            pl.BlockSpec((in_p, hid_p), lambda i: (0, 0), pipeline_mode=weight_mode),
            pl.BlockSpec((1, hid_p), lambda i: (0, 0), pipeline_mode=weight_mode),
            pl.BlockSpec((hid_p, hid_p), lambda i: (0, 0), pipeline_mode=weight_mode),
            pl.BlockSpec((1, hid_p), lambda i: (0, 0), pipeline_mode=weight_mode),
            pl.BlockSpec((hid_p, out_p), lambda i: (0, 0), pipeline_mode=weight_mode),
            pl.BlockSpec((1, out_p), lambda i: (0, 0), pipeline_mode=weight_mode),
        ],
        out_specs=pl.BlockSpec((tile_b, out_p), lambda i: (i, 0)),
        compiler_params=pltpu.CompilerParams(
            dimension_semantics=("parallel",),  # batch tiles shard across TCs on v7x
            vmem_limit_bytes=_vmem_limit_bytes(param_bytes, tile_b, in_p, hid_p, out_p),
        ),
        cost_estimate=cost,
    )(x, w1, b1, w2, b2, w3, b3)

    # Strip lane padding of the output features (128-lane store is kept dense in-kernel).
    return out[:, :output_dim]


# ---------------------------------------------------------------------------
# Parameter construction / preparation.
# ---------------------------------------------------------------------------
def init_params(key, input_dim, hidden_dim, output_dim):
    """PyTorch-layout params (w: [out, in], b: [out]) with nn.Linear default init."""
    def linear(k, fan_in, fan_out):
        kw, kb = jax.random.split(k)
        bound = float(fan_in) ** -0.5
        w = jax.random.uniform(kw, (fan_out, fan_in), jnp.float32, -bound, bound)
        b = jax.random.uniform(kb, (fan_out,), jnp.float32, -bound, bound)
        return w, b

    k1, k2, k3 = jax.random.split(key, 3)
    w1, b1 = linear(k1, input_dim, hidden_dim)
    w2, b2 = linear(k2, hidden_dim, hidden_dim)
    w3, b3 = linear(k3, hidden_dim, output_dim)
    return (w1, b1, w2, b2, w3, b3)


def prepare_params(torch_params, input_dim, hidden_dim, output_dim):
    """Transpose to [in, out], zero-pad out-features to 128 lanes, cast weights to bf16.

    Zero padding is exact: padded hidden columns have zero weights + zero bias, so ReLU
    leaves them at 0 and they contribute nothing downstream; padded output columns are
    sliced off in the wrapper. Biases stay f32 (added on the f32 elementwise path).
    """
    w1, b1, w2, b2, w3, b3 = torch_params
    hid_p = _round_up(hidden_dim, LANE)
    out_p = _round_up(output_dim, LANE)

    def pack(w, b, in_dim, in_pad, out_dim, out_pad):
        wt = jnp.zeros((in_pad, out_pad), jnp.float32).at[:in_dim, :out_dim].set(w.T)
        bt = jnp.zeros((1, out_pad), jnp.float32).at[0, :out_dim].set(b)
        return wt.astype(jnp.bfloat16), bt

    pw1, pb1 = pack(w1, b1, input_dim, input_dim, hidden_dim, hid_p)
    pw2, pb2 = pack(w2, b2, hidden_dim, hid_p, hidden_dim, hid_p)
    pw3, pb3 = pack(w3, b3, hidden_dim, hid_p, output_dim, out_p)
    return (pw1, pb1, pw2, pb2, pw3, pb3)


def mlp_actor_ref(x, torch_params):
    w1, b1, w2, b2, w3, b3 = torch_params
    h1 = jnp.maximum(x @ w1.T + b1, 0.0)
    h2 = jnp.maximum(h1 @ w2.T + b2, 0.0)
    return h2 @ w3.T + b3


if __name__ == "__main__":
    input_dim, hidden_dim, output_dim = 16, 32, 4

    key = jax.random.PRNGKey(0)
    k_params, k_x1, k_x2 = jax.random.split(key, 3)
    torch_params = init_params(k_params, input_dim, hidden_dim, output_dim)
    padded_params = prepare_params(torch_params, input_dim, hidden_dim, output_dim)

    # Small batch (single grid step, block equals full batch dim).
    x_small = jax.random.normal(k_x1, (8, input_dim), jnp.float32)
    logits_small = mlp_actor_forward(x_small, padded_params, output_dim)
    jax.block_until_ready(logits_small)
    ref_small = mlp_actor_ref(x_small, torch_params)
    assert logits_small.shape == (8, output_dim)
    assert jnp.allclose(logits_small, ref_small, atol=5e-2, rtol=5e-2)  # bf16 MXU path

    # Larger ragged batch: 2 grid steps, last block partial (no wrapper-side padding).
    x_large = jax.random.normal(k_x2, (300, input_dim), jnp.float32)
    logits_large = mlp_actor_forward(x_large, padded_params, output_dim)
    jax.block_until_ready(logits_large)
    ref_large = mlp_actor_ref(x_large, torch_params)
    assert logits_large.shape == (300, output_dim)
    assert jnp.allclose(logits_large, ref_large, atol=5e-2, rtol=5e-2)

    print("KERNEL_OK")
</pallas_src>

<mosaic_0001>
module attributes {stable_mosaic.version = 11 : i64} {
  func.func @mlp_actor_kernel(%arg0: i32, %arg1: memref<8x16xf32, #tpu.memory_space<vmem>>, %arg2: memref<16x128xbf16, #tpu.memory_space<vmem>>, %arg3: memref<1x128xf32, #tpu.memory_space<vmem>>, %arg4: memref<128x128xbf16, #tpu.memory_space<vmem>>, %arg5: memref<1x128xf32, #tpu.memory_space<vmem>>, %arg6: memref<128x128xbf16, #tpu.memory_space<vmem>>, %arg7: memref<1x128xf32, #tpu.memory_space<vmem>>, %arg8: memref<8x128xf32, #tpu.memory_space<vmem>>) attributes {dimension_semantics = [#tpu.dimension_semantics<parallel>], iteration_bounds = array<i64: 1>, scalar_prefetch = 0 : i64, scratch_operands = 0 : i64, tpu.core_type = #tpu.core_type<tc>, window_params = [{transform_indices = @transform_0, window_bounds = array<i64: 8, 16>}, {pipeline_mode = #tpu.pipeline_mode<synchronous>, transform_indices = @transform_1, window_bounds = array<i64: 16, 128>}, {pipeline_mode = #tpu.pipeline_mode<synchronous>, transform_indices = @transform_2, window_bounds = array<i64: 1, 128>}, {pipeline_mode = #tpu.pipeline_mode<synchronous>, transform_indices = @transform_3, window_bounds = array<i64: 128, 128>}, {pipeline_mode = #tpu.pipeline_mode<synchronous>, transform_indices = @transform_4, window_bounds = array<i64: 1, 128>}, {pipeline_mode = #tpu.pipeline_mode<synchronous>, transform_indices = @transform_5, window_bounds = array<i64: 128, 128>}, {pipeline_mode = #tpu.pipeline_mode<synchronous>, transform_indices = @transform_6, window_bounds = array<i64: 1, 128>}, {transform_indices = @transform_7, window_bounds = array<i64: 8, 128>}]} {
    %c0 = arith.constant 0 : index
    %c0_0 = arith.constant 0 : index
    %0 = vector.load %arg1[%c0, %c0_0] : memref<8x16xf32, #tpu.memory_space<vmem>>, vector<8x16xf32>
    %1 = arith.truncf %0 : vector<8x16xf32> to vector<8x16xbf16>
    %c0_1 = arith.constant 0 : index
    %c0_2 = arith.constant 0 : index
    %2 = vector.load %arg2[%c0_1, %c0_2] : memref<16x128xbf16, #tpu.memory_space<vmem>>, vector<16x128xbf16>
    %cst = arith.constant dense<0.000000e+00> : vector<8x128xf32>
    %3 = tpu.matmul %1, %2, %cst {dimension_numbers = #tpu.dot_dimension_numbers<[1], [0], [0], [1], [0, 0, 1, 1], [], []>} : vector<8x16xbf16>, vector<16x128xbf16>, vector<8x128xf32> -> vector<8x128xf32>
    %c0_3 = arith.constant 0 : index
    %c0_4 = arith.constant 0 : index
    %4 = vector.load %arg3[%c0_3, %c0_4] : memref<1x128xf32, #tpu.memory_space<vmem>>, vector<1x128xf32>
    %5 = vector.broadcast %4 : vector<1x128xf32> to vector<8x128xf32>
    %6 = arith.addf %3, %5 : vector<8x128xf32>
    %cst_5 = arith.constant 0.000000e+00 : f32
    %7 = vector.broadcast %cst_5 : f32 to vector<8x128xf32>
    %8 = arith.maximumf %6, %7 : vector<8x128xf32>
    %9 = arith.truncf %8 : vector<8x128xf32> to vector<8x128xbf16>
    %c0_6 = arith.constant 0 : index
    %c0_7 = arith.constant 0 : index
    %10 = vector.load %arg4[%c0_6, %c0_7] : memref<128x128xbf16, #tpu.memory_space<vmem>>, vector<128x128xbf16>
    %cst_8 = arith.constant dense<0.000000e+00> : vector<8x128xf32>
    %11 = tpu.matmul %9, %10, %cst_8 {dimension_numbers = #tpu.dot_dimension_numbers<[1], [0], [0], [1], [0, 0, 1, 1], [], []>} : vector<8x128xbf16>, vector<128x128xbf16>, vector<8x128xf32> -> vector<8x128xf32>
    %c0_9 = arith.constant 0 : index
    %c0_10 = arith.constant 0 : index
    %12 = vector.load %arg5[%c0_9, %c0_10] : memref<1x128xf32, #tpu.memory_space<vmem>>, vector<1x128xf32>
    %13 = vector.broadcast %12 : vector<1x128xf32> to vector<8x128xf32>
    %14 = arith.addf %11, %13 : vector<8x128xf32>
    %cst_11 = arith.constant 0.000000e+00 : f32
    %15 = vector.broadcast %cst_11 : f32 to vector<8x128xf32>
    %16 = arith.maximumf %14, %15 : vector<8x128xf32>
    %17 = arith.truncf %16 : vector<8x128xf32> to vector<8x128xbf16>
    %c0_12 = arith.constant 0 : index
    %c0_13 = arith.constant 0 : index
    %18 = vector.load %arg6[%c0_12, %c0_13] : memref<128x128xbf16, #tpu.memory_space<vmem>>, vector<128x128xbf16>
    %cst_14 = arith.constant dense<0.000000e+00> : vector<8x128xf32>
    %19 = tpu.matmul %17, %18, %cst_14 {dimension_numbers = #tpu.dot_dimension_numbers<[1], [0], [0], [1], [0, 0, 1, 1], [], []>} : vector<8x128xbf16>, vector<128x128xbf16>, vector<8x128xf32> -> vector<8x128xf32>
    %c0_15 = arith.constant 0 : index
    %c0_16 = arith.constant 0 : index
    %20 = vector.load %arg7[%c0_15, %c0_16] : memref<1x128xf32, #tpu.memory_space<vmem>>, vector<1x128xf32>
    %21 = vector.broadcast %20 : vector<1x128xf32> to vector<8x128xf32>
    %22 = arith.addf %19, %21 : vector<8x128xf32>
    %c0_17 = arith.constant 0 : index
    %c0_18 = arith.constant 0 : index
    %23 = vector.load %arg8[%c0_17, %c0_18] : memref<8x128xf32, #tpu.memory_space<vmem>>, vector<8x128xf32>
    tpu.vector_store %arg8[%c0_17, %c0_18], %22 {strides = array<i32>} : memref<8x128xf32, #tpu.memory_space<vmem>>, vector<8x128xf32>,
    return
  }
  func.func @transform_0(%arg0: i32) -> (i32, i32) {
    %c0_i32 = arith.constant 0 : i32
    %c0_i32_0 = arith.constant 0 : i32
    return %arg0, %c0_i32 : i32, i32
  }
  func.func @transform_1(%arg0: i32) -> (i32, i32) {
    %c0_i32 = arith.constant 0 : i32
    %c0_i32_0 = arith.constant 0 : i32
    %c0_i32_1 = arith.constant 0 : i32
    return %c0_i32, %c0_i32_0 : i32, i32
  }
  func.func @transform_2(%arg0: i32) -> (i32, i32) {
    %c0_i32 = arith.constant 0 : i32
    %c0_i32_0 = arith.constant 0 : i32
    %c0_i32_1 = arith.constant 0 : i32
    return %c0_i32, %c0_i32_0 : i32, i32
  }
  func.func @transform_3(%arg0: i32) -> (i32, i32) {
    %c0_i32 = arith.constant 0 : i32
    %c0_i32_0 = arith.constant 0 : i32
    %c0_i32_1 = arith.constant 0 : i32
    return %c0_i32, %c0_i32_0 : i32, i32
  }
  func.func @transform_4(%arg0: i32) -> (i32, i32) {
    %c0_i32 = arith.constant 0 : i32
    %c0_i32_0 = arith.constant 0 : i32
    %c0_i32_1 = arith.constant 0 : i32
    return %c0_i32, %c0_i32_0 : i32, i32
  }
  func.func @transform_5(%arg0: i32) -> (i32, i32) {
    %c0_i32 = arith.constant 0 : i32
    %c0_i32_0 = arith.constant 0 : i32
    %c0_i32_1 = arith.constant 0 : i32
    return %c0_i32, %c0_i32_0 : i32, i32
  }
  func.func @transform_6(%arg0: i32) -> (i32, i32) {
    %c0_i32 = arith.constant 0 : i32
    %c0_i32_0 = arith.constant 0 : i32
    %c0_i32_1 = arith.constant 0 : i32
    return %c0_i32, %c0_i32_0 : i32, i32
  }
  func.func @transform_7(%arg0: i32) -> (i32, i32) {
    %c0_i32 = arith.constant 0 : i32
    %c0_i32_0 = arith.constant 0 : i32
    return %arg0, %c0_i32 : i32, i32
  }
}

</mosaic_0001>

<bundles_post_ra>
// kernel: tpu_custom_call.1
= control target key start
LH: loop header
LB: loop body
LE: loop exit
PB: predicated region body
PF: predicated region fallthrough
CT: control target
= control target key end

     0   :  { %12 = vsyncpa [#allocation3], 0  ;;  %s764_s0 = inlined_call_operand.hbm [shape: f32[8,16], index: 0, kind: input, shape index: {}]   ;;  %s765_s1 = inlined_call_operand.hbm [shape: bf16[16,128], index: 1, kind: input, shape index: {}]   ;;  %s766_s2 = inlined_call_operand.vmem [shape: f32[1,128], index: 2, kind: input, shape index: {}]   ;;  %s767_s3 = inlined_call_operand.hbm [shape: bf16[128,128], index: 3, kind: input, shape index: {}]   ;;  %s768_s4 = inlined_call_operand.vmem [shape: f32[1,128], index: 4, kind: input, shape index: {}]   ;;  %s769_s5 = inlined_call_operand.hbm [shape: bf16[128,128], index: 5, kind: input, shape index: {}]   ;;  %s770_s6 = inlined_call_operand.vmem [shape: f32[1,128], index: 6, kind: input, shape index: {}]   ;;  %s771_s7 = inlined_call_operand.hbm [shape: f32[8,128], index: 7, kind: output, shape index: {}]  }
   0x1   :  { %13 = vsyncpa [#allocation6], 0 }
   0x2   :  { %14 = vsyncpa [#allocation9], 0 }
   0x3   :  { %15 = vsyncpa [#allocation4], 0  ;;  %s617_s24 = smov [#allocation5]   ;;  %s499_s28 = scalar_lea.hbm %s765_s1, 128 }
   0x4   :  { %s31_s25 = sshll.u32 %s617_s24, 4  ;;  %p500_p0 = scmp.ne.s32.totalorder %s765_s1, %s499_s28  ;;  %s32_s25 = int_to_ptr.vmem [resolvable:$true] %s31_s25 }
   0x5   :  { %p503_p1 = scmp.lt.u32.totalorder %s499_s28, %s765_s1 }
   0x7   :  { %p505_p2 = pnand %p503_p1, %p500_p0 }
   0x9   :  { %508 = shalt.err (!%p505_p2)
}
   0xa   :  { %s509_s10 = scalar_lea.vmem %s32_s25, 128  ;;  %p514_p4 = scmp.lt.s32.totalorder %s32_s25, %s32_s25 }
   0xb   :  { %p510_p3 = scmp.ne.s32.totalorder %s32_s25, %s509_s10  ;;  %p515_p5 = scmp.lt.s32.totalorder %s509_s10, %s509_s10 }
   0xd   :  { %p516_p6 = por %p515_p5, %p514_p4 }
   0xf   :  { %p517_p7 = pnand %p516_p6, %p510_p3 }
  0x11   :  { %520 = shalt.err (!%p517_p7)
}
  0x12   :  { %s618_s11 = smov 64   ;;  %s619_s12 = smov 4  }
  0x13   :  { %37 = dma.hbm_to_vmem [thread:$0]  %s765_s1, 128, %s32_s25, [#allocation6], %s618_s11, %s618_s11, %s619_s12  }
  0x14   :  { %s620_s15 = smov [#allocation2]   ;;  %s621_s17 = smov [#allocation7]  }
  0x15   :  { %s22_s16 = sshll.u32 %s620_s15, 4  ;;  %s45_s18 = sshll.u32 %s621_s17, 4  ;;  %s23_s16 = int_to_ptr.vmem [resolvable:$true] %s22_s16  ;;  %s46_s18 = int_to_ptr.vmem [resolvable:$true] %s45_s18 }
  0x16   :  { %s521_s21 = scalar_lea.hbm %s764_s0, 128 }
  0x17   :  { %p522_p8 = scmp.ne.s32.totalorder %s764_s0, %s521_s21  ;;  %p525_p9 = scmp.lt.u32.totalorder %s521_s21, %s764_s0 }
  0x19   :  { %p527_p10 = pnand %p525_p9, %p522_p8 }
  0x1b   :  { %530 = shalt.err (!%p527_p10)
}
  0x1c   :  { %s531_s1 = scalar_lea.vmem %s23_s16, 128  ;;  %p536_p12 = scmp.lt.s32.totalorder %s23_s16, %s23_s16 }
  0x1d   :  { %p532_p11 = scmp.ne.s32.totalorder %s23_s16, %s531_s1  ;;  %p537_p13 = scmp.lt.s32.totalorder %s531_s1, %s531_s1 }
  0x1f   :  { %p538_p0 = por %p537_p13, %p536_p12 }
  0x21   :  { %p539_p1 = pnand %p538_p0, %p532_p11 }
  0x23   :  { %542 = shalt.err (!%p539_p1)
}
  0x24   :  { %25 = dma.hbm_to_vmem [thread:$0]  %s764_s0, 128, %s23_s16, [#allocation3]  }
  0x25   :  { %s543_s30 = scalar_lea.hbm %s767_s3, 1024 }
  0x26   :  { %p544_p2 = scmp.ne.s32.totalorder %s767_s3, %s543_s30  ;;  %p547_p3 = scmp.lt.u32.totalorder %s543_s30, %s767_s3 }
  0x28   :  { %p549_p4 = pnand %p547_p3, %p544_p2 }
  0x2a   :  { %552 = shalt.err (!%p549_p4)
}
  0x2b   :  { %s553_s14 = scalar_lea.vmem %s46_s18, 1024  ;;  %p558_p6 = scmp.lt.s32.totalorder %s46_s18, %s46_s18 }
  0x2c   :  { %p554_p5 = scmp.ne.s32.totalorder %s46_s18, %s553_s14  ;;  %p559_p7 = scmp.lt.s32.totalorder %s553_s14, %s553_s14 }
  0x2e   :  { %p560_p8 = por %p559_p7, %p558_p6 }
  0x30   :  { %p561_p9 = pnand %p560_p8, %p554_p5 }
  0x32   :  { %564 = shalt.err (!%p561_p9)
}
  0x33   :  { %51 = dma.hbm_to_vmem [thread:$0]  %s767_s3, 1024, %s46_s18, [#allocation6], %s618_s11, %s618_s11, %s619_s12  }
  0x34   :  { %s622_s16 = smov [#allocation8]   ;;  %s565_s21 = scalar_lea.hbm %s769_s5, 1024 }
  0x35   :  { %s59_s17 = sshll.u32 %s622_s16, 4  ;;  %p566_p10 = scmp.ne.s32.totalorder %s769_s5, %s565_s21  ;;  %s60_s17 = int_to_ptr.vmem [resolvable:$true] %s59_s17 }
  0x36   :  { %p569_p11 = scmp.lt.u32.totalorder %s565_s21, %s769_s5 }
  0x38   :  { %p571_p12 = pnand %p569_p11, %p566_p10 }
  0x3a   :  { %574 = shalt.err (!%p571_p12)
}
  0x3b   :  { %s575_s1 = scalar_lea.vmem %s60_s17, 1024  ;;  %p580_p0 = scmp.lt.s32.totalorder %s60_s17, %s60_s17 }
  0x3c   :  { %p576_p13 = scmp.ne.s32.totalorder %s60_s17, %s575_s1  ;;  %p581_p1 = scmp.lt.s32.totalorder %s575_s1, %s575_s1 }
  0x3e   :  { %p582_p2 = por %p581_p1, %p580_p0 }
  0x40   :  { %p583_p3 = pnand %p582_p2, %p576_p13 }
  0x42   :  { %586 = shalt.err (!%p583_p3)
}
  0x43   :  { %65 = dma.hbm_to_vmem [thread:$0]  %s769_s5, 1024, %s60_s17, [#allocation9], %s618_s11, %s618_s11, %s619_s12  }
  0x44   :  { %609 = dma.done.wait [#allocation3], 128  }
  0x45   :  { %610 = vsyncadd [#allocation3], 4294967168 }
  0x46   :  { %611 = dma.done.wait [#allocation6], 1152  }
  0x47   :  { %612 = vsyncadd [#allocation6], 4294966144 }
  0x48   :  { %613 = dma.done.wait [#allocation9], 1024  }
  0x49   :  { %614 = vsyncadd [#allocation9], 4294966272  ;;  %v623_v0 = vmov 0.0   ;;  %vm624_vm0 = vmmov 0   ;;  %v482_v1 = vld [vmem:[#allocation5] sm:$0xff]   ;;  %v81_v2 = vld [vmem:[#allocation2] sm:$0xff] }
  0x4a   :  { %427 = vmatprep.subr.bf16.mxu0 %v623_v0  ;;  %429 = vmatprep.mubr.msk.bf16.mxu0 %vm624_vm0, %v623_v0  ;;  %v82_v3 = vpack.c.bf16 %v81_v2, %v81_v2  ;;  %vm98_vm1 = vcmask 130048   ;;  %v483_v4 = vld [vmem:[#allocation7] sm:$0xff]   ;;  %v484_v5 = vld [vmem:[#allocation7 + $0x8] sm:$0xff]   ;;  %v485_v6 = vld [vmem:[#allocation7 + $0x10] sm:$0xff]   ;;  %s625_s28 = smov [#allocation10]  }
  0x4b   :  { %433 = vmatprep.subr.bf16.mxu1 %v623_v0  ;;  %449 = vmatprep.mubr.msk.bf16.mxu1 %vm624_vm0, %v623_v0  ;;  %v486_v7 = vld [vmem:[#allocation7 + $0x18] sm:$0xff]   ;;  %v487_v8 = vld [vmem:[#allocation7 + $0x20] sm:$0xff]   ;;  %v488_v9 = vld [vmem:[#allocation7 + $0x28] sm:$0xff]   ;;  %s375_s29 = sshll.u32 %s625_s28, 4  ;;  %s376_s29 = int_to_ptr.vmem [resolvable:$true] %s375_s29 }
  0x4c   :  { %428 = vmatpush3.bf16.msra.mxu0 %v482_v1  ;;  %434 = vmatpush3.bf16.msra.mxu1 %v483_v4  ;;  %v489_v10 = vld [vmem:[#allocation7 + $0x30] sm:$0xff]   ;;  %v490_v11 = vld [vmem:[#allocation7 + $0x38] sm:$0xff]   ;;  %v491_v12 = vld [vmem:[#allocation8] sm:$0xff]   ;;  %p592_p5 = scmp.lt.s32.totalorder %s376_s29, %s376_s29 }
  0x4d   :  { %453 = vmatprep.subr.bf16.mxu0 %v623_v0  ;;  %435 = vmatprep.subr.bf16.mxu1 %v623_v0  ;;  %v492_v13 = vld [vmem:[#allocation8 + $0x8] sm:$0xff]   ;;  %v493_v14 = vld [vmem:[#allocation8 + $0x10] sm:$0xff]   ;;  %v494_v15 = vld [vmem:[#allocation8 + $0x18] sm:$0xff]  }
  0x4e   :  { %v495_v16 = vld [vmem:[#allocation8 + $0x20] sm:$0xff]   ;;  %v496_v17 = vld [vmem:[#allocation8 + $0x28] sm:$0xff]   ;;  %v386_v18 = vld [vmem:[%s766_s2] ss:$0 sm:$0xff] }
  0x4f   :  { %430 = vmatmul.mubr.msk.bf16.vlgmr.msra.gmra.mrb[0].mxu0 %vm98_vm1, %v82_v3  ;;  %v497_v26 = vld [vmem:[#allocation8 + $0x30] sm:$0xff]   ;;  %v498_v27 = vld [vmem:[#allocation8 + $0x38] sm:$0xff]  }
  0x50   :  { %469 = vmatprep.mubr.msk.bf16.mxu0 %vm624_vm0, %v623_v0  ;;  %436 = vmatpush3.bf16.msra.mxu1 %v484_v5  ;;  %v389_v28 = vld [vmem:[%s768_s4] ss:$0 sm:$0xff]  ;;  %s587_s4 = scalar_lea.vmem %s376_s29, 128 }
  0x51   :  { %437 = vmatprep.subr.bf16.mxu1 %v623_v0  ;;  %454 = vmatpush3.bf16.msra.mxu0 %v491_v12  ;;  %v398_v36 = vld [vmem:[%s770_s6] ss:$0 sm:$0xff]  ;;  %p588_p4 = scmp.ne.s32.totalorder %s376_s29, %s587_s4  ;;  %p593_p6 = scmp.lt.s32.totalorder %s587_s4, %s587_s4 }
  0x52   :  { %455 = vmatprep.subr.bf16.mxu0 %v623_v0 }
  0x53   :  { %p594_p7 = por %p593_p6, %p592_p5 }
  0x54   :  { %438 = vmatpush3.bf16.msra.mxu1 %v485_v6 }
  0x55   :  { %439 = vmatprep.subr.bf16.mxu1 %v623_v0  ;;  %456 = vmatpush3.bf16.msra.mxu0 %v492_v13  ;;  %p595_p8 = pnand %p594_p7, %p588_p4 }
  0x56   :  { %457 = vmatprep.subr.bf16.mxu0 %v623_v0 }
  0x58   :  { %440 = vmatpush3.bf16.msra.mxu1 %v486_v7 }
  0x59   :  { %441 = vmatprep.subr.bf16.mxu1 %v623_v0  ;;  %458 = vmatpush3.bf16.msra.mxu0 %v493_v14 }
  0x5a   :  { %459 = vmatprep.subr.bf16.mxu0 %v623_v0 }
  0x5c   :  { %442 = vmatpush3.bf16.msra.mxu1 %v487_v8 }
  0x5d   :  { %443 = vmatprep.subr.bf16.mxu1 %v623_v0  ;;  %460 = vmatpush3.bf16.msra.mxu0 %v494_v15 }
  0x5e   :  { %461 = vmatprep.subr.bf16.mxu0 %v623_v0 }
  0x60   :  { %444 = vmatpush3.bf16.msra.mxu1 %v488_v9 }
  0x61   :  { %445 = vmatprep.subr.bf16.mxu1 %v623_v0  ;;  %462 = vmatpush3.bf16.msra.mxu0 %v495_v16 }
  0x62   :  { %463 = vmatprep.subr.bf16.mxu0 %v623_v0 }
  0x64   :  { %446 = vmatpush3.bf16.msra.mxu1 %v489_v10 }
  0x65   :  { %447 = vmatprep.subr.bf16.mxu1 %v623_v0  ;;  %464 = vmatpush3.bf16.msra.mxu0 %v496_v17 }
  0x66   :  { %465 = vmatprep.subr.bf16.mxu0 %v623_v0 }
  0x68   :  { %448 = vmatpush3.bf16.msra.mxu1 %v490_v11 }
  0x69   :  { %466 = vmatpush3.bf16.msra.mxu0 %v497_v26 }
  0x6a   :  { %467 = vmatprep.subr.bf16.mxu0 %v623_v0 }
  0x6d   :  { %468 = vmatpush3.bf16.msra.mxu0 %v498_v27 }
 0x122   :  { %v136_v19 = vpop.f32.mrb[0].mxu0 }
 0x123   :  { %v137_v20 = vadd.f32 %v386_v18, %v136_v19  ;;  %v431_v21 = vpop.f32.mrb[1].mxu0 }
 0x124   :  { %v139_v22 = vpop.f32.mrb[2].mxu0 }
 0x125   :  { %v142_v23 = vmax.f32 %v137_v20, 0.0  ;;  %v432_v24 = vpop.f32.mrb[3].mxu0 }
 0x127   :  { %v143_v25 = vpack.c.bf16 %v142_v23, %v142_v23 }
 0x129   :  { %450 = vmatmul.mubr.bf16.vlgmr.msra.gmra.mrb[0].mxu1 %v143_v25 }
 0x1fc   :  { %v249_v29 = vpop.f32.mrb[0].mxu1 }
 0x1fd   :  { %v250_v30 = vadd.f32 %v389_v28, %v249_v29  ;;  %v451_v31 = vpop.f32.mrb[1].mxu1 }
 0x1fe   :  { %v252_v32 = vpop.f32.mrb[2].mxu1 }
 0x1ff   :  { %v255_v33 = vmax.f32 %v250_v30, 0.0  ;;  %v452_v34 = vpop.f32.mrb[3].mxu1 }
 0x201   :  { %v256_v35 = vpack.c.bf16 %v255_v33, %v255_v33 }
 0x203   :  { %470 = vmatmul.mubr.bf16.vlgmr.msra.gmra.mrb[4].mxu0 %v256_v35 }
 0x2d6   :  { %v362_v37 = vpop.f32.mrb[4].mxu0 }
 0x2d7   :  { %v363_v38 = vadd.f32 %v398_v36, %v362_v37  ;;  %v471_v39 = vpop.f32.mrb[5].mxu0 }
 0x2d8   :  { %v365_v40 = vpop.f32.mrb[6].mxu0 }
 0x2d9   :  { %368 = vst [vmem:[#allocation10] sm:$0xff] %v363_v38  ;;  %v472_v41 = vpop.f32.mrb[7].mxu0 }
 0x2da   :  { %598 = shalt.err (!%p595_p8)
}
 0x2db   :  { %s599_s6 = scalar_lea.hbm %s771_s7, 128 }
 0x2dc   :  { %p600_p9 = scmp.ne.s32.totalorder %s771_s7, %s599_s6  ;;  %p603_p10 = scmp.lt.u32.totalorder %s599_s6, %s771_s7 }
 0x2de   :  { %p605_p11 = pnand %p603_p10, %p600_p9 }
 0x2e0   :  { %608 = shalt.err (!%p605_p11)
}
 0x2e1   :  { %378 = dma.vmem_to_hbm [thread:$0]  %s376_s29, 128, %s771_s7, [#allocation4]  }
 0x2e2   :  { %615 = dma.done.wait [#allocation4], 128  }
 0x2e3   :  { %616 = vsyncadd [#allocation4], 4294967168 }
 0x2e4   :  { %382 = vsyncpa [#allocation3], 1 }
 0x2e5   :  { %383 = vsyncpa [#allocation6], 1 }
 0x2e6   :  { %384 = vsyncpa [#allocation9], 1 }
 0x2e7   :  { %385 = vsyncpa [#allocation4], 1 }

</bundles_post_ra>
